<compile_context>
chip_gen: v7x
topology: tpu7x:2x2x1
jax: 0.10.0
libtpu: 0.0.40
codegen_flags: <defaults>
</compile_context>

<pallas_src>
import functools

import jax
import jax.numpy as jnp
from jax import lax
from jax.experimental import pallas as pl
from jax.experimental.pallas import tpu as pltpu


def _chunk_sumsq_kernel(x_ref, o_ref):
    # x_ref: (tile, chunk) slice of the (B*n_chunks, chunk) audio row view.
    # o_ref: lane-dense per-row sum of squares, (8, tile//8) or (1, rows).
    x = x_ref[...].astype(jnp.float32)
    s = jnp.sum(x * x, axis=-1)              # (tile,) per-row sums
    o_ref[...] = s.reshape(o_ref.shape)      # tiny relayout (tile floats) -> lane-dense store


@functools.partial(jax.jit,
                   static_argnames=("hop_length", "window_length", "tile_rows"))
def rms_extract(inp, hop_length=512, window_length=2048, tile_rows=8192):
    """Pallas equivalent of RMSExtractor.forward. inp: (batch, samples)."""
    assert window_length % hop_length == 0 and hop_length % 2 == 0
    B, S = inp.shape
    r = window_length // hop_length            # hop-chunks per window
    chunk = hop_length // 2                    # half-hop unit; pad is a multiple of it
    pad = (window_length - hop_length) // 2    # == (r - 1) * chunk
    # TODO(synk): only samples % hop_length == 0 supported (general lengths need a
    # ragged tail chunk); reflect pad also requires samples > pad, same as torch.
    assert S % hop_length == 0 and S > pad

    n_u = S // chunk                           # number of unpadded half-hop chunks
    rows = B * n_u
    x_rows = inp.reshape(rows, chunk)          # free contiguous view, no HBM copy
    itemsize = jnp.dtype(inp.dtype).itemsize

    # ---- tile selection ----------------------------------------------------
    # Main path: tile is a multiple of 1024 rows (bf16-friendly sublanes,
    # tile//8 a multiple of 128 lanes), capped at ~8 MiB per block so 2x
    # double-buffering fits comfortably on all generations (v7x has 64 MiB
    # VMEM/TC), and capped at rows//4 so the grid has >= ~4 steps for the
    # "parallel" axis to be shared by v7x's two TensorCores.
    tile_rows = max(1024, (int(tile_rows) // 1024) * 1024)
    if rows >= 2048:
        max_tile_vmem = max(1024, ((8 * 1024 * 1024) // (chunk * itemsize)) // 1024 * 1024)
        tile = max(1024, min(tile_rows, max_tile_vmem, (rows // 4) // 1024 * 1024))
        out_block = (8, tile // 8)             # lane-dense output block
    else:
        tile = rows                            # tiny clip: one full-extent block
        out_block = (1, rows)
    num_tiles = pl.cdiv(rows, tile)
    out_rows = num_tiles * out_block[0]

    chunk_sums = pl.pallas_call(
        _chunk_sumsq_kernel,
        grid=(num_tiles,),
        out_shape=jax.ShapeDtypeStruct((out_rows, out_block[1]), jnp.float32),
        in_specs=[pl.BlockSpec((tile, chunk), lambda i: (i, 0))],
        out_specs=pl.BlockSpec(out_block, lambda i: (i, 0)),
        compiler_params=pltpu.CompilerParams(
            dimension_semantics=("parallel",),
            vmem_limit_bytes=32 * 1024 * 1024,
        ),
        cost_estimate=pl.CostEstimate(
            flops=2 * rows * chunk,
            transcendentals=0,
            bytes_accessed=rows * chunk * itemsize + out_rows * out_block[1] * 4,
        ),
    )(x_rows)
    # Flat order is preserved (block i, row j -> flat i*tile + j); any padded
    # tail rows of a partial last block land at positions >= rows -> sliced off.
    u = chunk_sums.reshape(-1)[:rows].reshape(B, n_u)   # interior padded-chunk sums

    # ---- tiny XLA epilogue (arrays are ~1/chunk the size of the audio) ----
    # Pure-reflect edge chunks of the padded squared signal, from 2*pad edge samples.
    sq_l = inp[:, 1:pad + 1].astype(jnp.float32) ** 2             # (B, pad)
    left = jnp.flip(sq_l.reshape(B, r - 1, chunk).sum(-1), axis=1)
    sq_r = inp[:, S - pad - 1:S - 1].astype(jnp.float32) ** 2     # (B, pad)
    right = jnp.flip(sq_r.reshape(B, r - 1, chunk).sum(-1), axis=1)

    p_chunks = jnp.concatenate([left, u, right], axis=1)          # (B, n_u + 2(r-1))
    # frame f = sum of padded half-hop chunks [2f, 2f + 2r): one strided conv.
    win = jnp.ones((1, 1, 2 * r), jnp.float32)
    frame_sums = lax.conv_general_dilated(
        p_chunks[:, None, :], win, window_strides=(2,), padding="VALID",
        dimension_numbers=("NCH", "OIH", "NCH"),
        precision=lax.Precision.HIGHEST)[:, 0, :]                 # (B, n_frames)
    return jnp.sqrt(frame_sums * (1.0 / window_length))


def _rms_ref(inp, hop, window):
    """Pure-JAX reference matching the PyTorch module exactly."""
    pad = (window - hop) // 2
    sq = inp.astype(jnp.float32) ** 2
    x = jnp.pad(sq, ((0, 0), (pad, pad)), mode="reflect")
    n_frames = (x.shape[1] - window) // hop + 1
    idx = jnp.arange(n_frames)[:, None] * hop + jnp.arange(window)[None, :]
    frames = x[:, idx]                                            # (B, n_frames, window)
    return jnp.sqrt(frames.mean(axis=-1))


if __name__ == "__main__":
    hop_length = 512
    window_length = 2048

    key = jax.random.PRNGKey(0)
    k1, k2 = jax.random.split(key)

    # 1) Small clip -> single full-extent block path.
    x_small = jax.random.normal(k1, (2, 4096), dtype=jnp.float32)
    out_s = jax.block_until_ready(
        rms_extract(x_small, hop_length=hop_length, window_length=window_length))
    ref_s = _rms_ref(x_small, hop_length, window_length)
    assert out_s.shape == ref_s.shape == (2, 4096 // hop_length)
    assert jnp.allclose(out_s, ref_s, atol=1e-5, rtol=1e-5)

    # 2) Longer clip -> multi-tile streaming path with a partial last block
    #    (rows = 6*98304/256 = 2304, tile = 1024 -> 3 grid steps).
    x_big = jax.random.normal(k2, (6, 98304), dtype=jnp.float32)
    out_b = jax.block_until_ready(
        rms_extract(x_big, hop_length=hop_length, window_length=window_length))
    ref_b = _rms_ref(x_big, hop_length, window_length)
    assert out_b.shape == ref_b.shape == (6, 98304 // hop_length)
    assert jnp.allclose(out_b, ref_b, atol=1e-5, rtol=1e-5)

    # 3) bf16 input (halves HBM read bytes on the bandwidth-bound hot path;
    #    accumulation stays f32 inside the kernel).
    x_bf16 = x_small.astype(jnp.bfloat16)
    out_h = jax.block_until_ready(
        rms_extract(x_bf16, hop_length=hop_length, window_length=window_length))
    ref_h = _rms_ref(x_bf16.astype(jnp.float32), hop_length, window_length)
    assert jnp.allclose(out_h, ref_h, atol=1e-4, rtol=1e-4)

    print("KERNEL_OK")
</pallas_src>

<mosaic_0001>
module attributes {stable_mosaic.version = 11 : i64} {
  func.func @_chunk_sumsq_kernel(%arg0: i32, %arg1: memref<32x256xf32, #tpu.memory_space<vmem>>, %arg2: memref<1x32xf32, #tpu.memory_space<vmem>>) attributes {dimension_semantics = [#tpu.dimension_semantics<parallel>], iteration_bounds = array<i64: 1>, scalar_prefetch = 0 : i64, scratch_operands = 0 : i64, tpu.core_type = #tpu.core_type<tc>, window_params = [{transform_indices = @transform_0, window_bounds = array<i64: 32, 256>}, {transform_indices = @transform_1, window_bounds = array<i64: 1, 32>}]} {
    %c0 = arith.constant 0 : index
    %c0_0 = arith.constant 0 : index
    %0 = vector.load %arg1[%c0, %c0_0] : memref<32x256xf32, #tpu.memory_space<vmem>>, vector<32x256xf32>
    %1 = arith.mulf %0, %0 : vector<32x256xf32>
    %cst = arith.constant dense<0.000000e+00> : vector<32xf32>
    %2 = vector.multi_reduction <add>, %1, %cst [1] : vector<32x256xf32> to vector<32xf32>
    %3 = vector.shape_cast %2 : vector<32xf32> to vector<1x32xf32>
    %c0_1 = arith.constant 0 : index
    %c0_2 = arith.constant 0 : index
    %4 = vector.load %arg2[%c0_1, %c0_2] : memref<1x32xf32, #tpu.memory_space<vmem>>, vector<1x32xf32>
    tpu.vector_store %arg2[%c0_1, %c0_2], %3 {strides = array<i32>} : memref<1x32xf32, #tpu.memory_space<vmem>>, vector<1x32xf32>,
    return
  }
  func.func @transform_0(%arg0: i32) -> (i32, i32) {
    %c0_i32 = arith.constant 0 : i32
    %c0_i32_0 = arith.constant 0 : i32
    return %arg0, %c0_i32 : i32, i32
  }
  func.func @transform_1(%arg0: i32) -> (i32, i32) {
    %c0_i32 = arith.constant 0 : i32
    %c0_i32_0 = arith.constant 0 : i32
    return %arg0, %c0_i32 : i32, i32
  }
}

</mosaic_0001>

<bundles_post_ra>
// kernel: rms_extract.1
= control target key start
LH: loop header
LB: loop body
LE: loop exit
PB: predicated region body
PF: predicated region fallthrough
CT: control target
= control target key end

     0   :  { %v40_v20 = vlaneseq  ;;  %vm51_vm0 = vcmask 130112   ;;  %vm58_vm1 = vcmask 195712   ;;  %vm65_vm2 = vcmask 261312   ;;  %s111_s0 = inlined_call_operand.vmem [shape: f32[32,256], index: 0, kind: input, shape index: {}]   ;;  %s112_s1 = inlined_call_operand.vmem [shape: f32[1,32], index: 1, kind: output, shape index: {}]  }
   0x1   :  { %v8_v0 = vld [vmem:[%s111_s0] sm:$0xff]  ;;  %v9_v1 = vld [vmem:[%s111_s0 + $0x8] sm:$0xff]  ;;  %v10_v7 = vld [vmem:[%s111_s0 + $0x10] sm:$0xff]  ;;  %vm68_vm3 = vcmask 253952  }
   0x2   :  { %v12_v2 = vld [vmem:[%s111_s0 + $0x20] sm:$0xff]  ;;  %v16_v3 = vmul.f32 %v8_v0, %v8_v0  ;;  %v17_v4 = vmul.f32 %v9_v1, %v9_v1  ;;  %v13_v5 = vld [vmem:[%s111_s0 + $0x28] sm:$0xff]  ;;  %v11_v8 = vld [vmem:[%s111_s0 + $0x18] sm:$0xff]  ;;  %v18_v10 = vmul.f32 %v10_v7, %v10_v7  ;;  %v41_v21 = vand.u32 127, %v40_v20 }
   0x3   :  { %v20_v6 = vmul.f32 %v12_v2, %v12_v2  ;;  %v21_v9 = vmul.f32 %v13_v5, %v13_v5  ;;  %v19_v11 = vmul.f32 %v11_v8, %v11_v8  ;;  %v14_v12 = vld [vmem:[%s111_s0 + $0x30] sm:$0xff]  ;;  %v15_v13 = vld [vmem:[%s111_s0 + $0x38] sm:$0xff]  ;;  %v43_v22 = vshrl.u32 %v40_v20, 7 }
   0x4   :  { %v24_v14 = vadd.f32 %v17_v4, %v16_v3  ;;  %v22_v15 = vmul.f32 %v14_v12, %v14_v12  ;;  %v23_v16 = vmul.f32 %v15_v13, %v15_v13  ;;  %v46_v23 = vadd.s32 4294967288, %v41_v21 }
   0x5   :  { %v30_v17 = vadd.f32 %v21_v9, %v20_v6  ;;  %v27_v18 = vadd.f32 %v19_v11, %v18_v10  ;;  %v53_v24 = vadd.s32 4294967280, %v41_v21  ;;  %v60_v25 = vadd.s32 4294967272, %v41_v21 }
   0x6   :  { %25 = vadd.xlane.f32.xlu0 %v24_v14  ;;  %v33_v19 = vadd.f32 %v23_v16, %v22_v15  ;;  %v44_v27 = vsub.s32 %v41_v21, %v43_v22  ;;  %v49_v29 = vsub.s32 %v46_v23, %v43_v22 }
   0x7   :  { %31 = vadd.xlane.f32.xlu1 %v30_v17  ;;  %v56_v30 = vsub.s32 %v53_v24, %v43_v22  ;;  %v63_v31 = vsub.s32 %v60_v25, %v43_v22 }
   0xa   :  { %28 = vadd.xlane.f32.xlu0 %v27_v18 }
   0xb   :  { %34 = vadd.xlane.f32.xlu1 %v33_v19 }
  0x93   :  { %v26_v26 = vpop.xlane.xlu0 %25 }
  0x94   :  { %v32_v28 = vpop.xlane.xlu1 %31  ;;  %v45_v33 = vrot.slane %v26_v26, %v44_v27 }
  0x95   :  { %v57_v36 = vrot.slane %v32_v28, %v56_v30 }
  0x97   :  { %v29_v32 = vpop.xlane.xlu0 %28 }
  0x98   :  { %v50_v34 = vrot.slane %v29_v32, %v49_v29  ;;  %v35_v35 = vpop.xlane.xlu1 %34 }
  0x99   :  { %v64_v37 = vrot.slane %v35_v35, %v63_v31 }
  0x9a   :  { %v52_v38 = vsel %vm51_vm0, %v50_v34, %v45_v33 }
  0x9b   :  { %v59_v39 = vsel %vm58_vm1, %v57_v36, %v52_v38 }
  0x9c   :  { %v66_v40 = vsel %vm65_vm2, %v64_v37, %v59_v39 }
  0x9d   :  { %69 = vst.msk [vmem:[%s112_s1] sm:$0x1] %vm68_vm3, %v66_v40 }

</bundles_post_ra>
